<compile_context>
chip_gen: v7x
topology: tpu7x:2x2x1
jax: 0.10.0
libtpu: 0.0.40
codegen_flags: <defaults>
</compile_context>

<pallas_src>
import functools

import jax
import jax.numpy as jnp
from jax.experimental import pallas as pl
from jax.experimental.pallas import tpu as pltpu


def _fovea_kernel(smooth_ref, x_ref, o_ref):
    # x_ref: (TILE_ROWS, K) tile in VMEM. Row-wise softmax(x * smooth) * x.
    x = x_ref[...].astype(jnp.float32)
    s = smooth_ref[0]                                   # scalar from SMEM
    xs = x * s
    m = jnp.max(xs, axis=-1, keepdims=True)
    e = jnp.exp(xs - m)                                 # EUP
    denom = jnp.sum(e, axis=-1, keepdims=True)          # XLU reduce
    mask = e * pl.reciprocal(denom, approx=True)        # EUP vrcp (free slot)
    o_ref[...] = (mask * x).astype(o_ref.dtype)


def _round_up(n, m):
    return ((n + m - 1) // m) * m


def _pick_tile_rows(rows, k, dtype):
    """Row-tile size: big (mem-bound streaming), sublane-aligned, megacore-aware."""
    itemsize = jnp.dtype(dtype).itemsize
    # Minimum sublane tile: 8 for 4-byte, 16 for 2-byte, 32 for 1-byte dtypes.
    sub = max(8, 32 // itemsize)
    # Target ~2 MiB per input tile in the I/O dtype. With double-buffered
    # input + output this stays comfortably under the scoped-VMEM defaults on
    # v5e (16 MiB) and v6e/v7x (32 MiB), so no vmem_limit override is needed.
    target_bytes = 2 * 1024 * 1024
    tr = max(sub, (target_bytes // max(1, k * itemsize)) // sub * sub)
    # Never bigger than the (sublane-rounded) problem.
    tr = min(tr, _round_up(rows, sub))
    # Prefer >= 2 grid steps when the problem allows it, so v7x's two
    # TensorCores both get work under dimension_semantics=("parallel",).
    if rows > sub and -(-rows // tr) < 2:
        tr = max(sub, _round_up(-(-rows // 2), sub))
    return int(tr)


@functools.partial(jax.jit, static_argnames=("tile_rows",))
def _fovea_2d(x2d, smooth, tile_rows):
    rows, k = x2d.shape
    grid = (pl.cdiv(rows, tile_rows),)                  # partial last block OK
    return pl.pallas_call(
        _fovea_kernel,
        out_shape=jax.ShapeDtypeStruct((rows, k), x2d.dtype),
        grid_spec=pl.GridSpec(
            grid=grid,
            in_specs=[
                pl.BlockSpec(memory_space=pltpu.SMEM),           # smooth scalar
                pl.BlockSpec((tile_rows, k), lambda i: (i, 0)),  # x row tile
            ],
            out_specs=pl.BlockSpec((tile_rows, k), lambda i: (i, 0)),
        ),
        compiler_params=pltpu.CompilerParams(
            dimension_semantics=("parallel",)),
    )(smooth, x2d)


def fovea(x, smooth_param=None):
    """x: [b, c, h, w]. smooth_param: None (smooth=False) or (1,) f32 array."""
    b, c, h, w = x.shape
    rows, k = b * c, h * w
    x2d = x.reshape(rows, k)        # contiguous view; no HBM copy under XLA

    if smooth_param is None:
        smooth = jnp.ones((1,), jnp.float32)            # identity scale
    else:
        smooth = jnp.asarray(smooth_param, jnp.float32).reshape(1)

    tile_rows = _pick_tile_rows(rows, k, x2d.dtype)
    out2d = _fovea_2d(x2d, smooth, tile_rows=tile_rows)
    return out2d.reshape(b, c, h, w)


def fovea_reference(x, smooth_param=None):
    b, c, h, w = x.shape
    xf = x.reshape(b, c, h * w).astype(jnp.float32)
    s = 1.0 if smooth_param is None else jnp.asarray(smooth_param, jnp.float32)[0]
    mask = jax.nn.softmax(xf * s, axis=-1)
    return (mask * xf).reshape(b, c, h, w).astype(x.dtype)


if __name__ == "__main__":
    key = jax.random.PRNGKey(0)
    b, c, h, w = 2, 4, 16, 16
    x = jax.random.normal(key, (b, c, h, w), dtype=jnp.float32)

    # smooth=True in the module => nn.Parameter(zeros(1) + 10.0)
    smooth_param = jnp.zeros((1,), jnp.float32) + 10.0

    # smooth=True path
    out_smooth = jax.block_until_ready(fovea(x, smooth_param))
    ref_smooth = fovea_reference(x, smooth_param)
    assert jnp.allclose(out_smooth, ref_smooth, atol=5e-3, rtol=5e-3), (
        float(jnp.max(jnp.abs(out_smooth - ref_smooth))))

    # smooth=False path
    out_plain = jax.block_until_ready(fovea(x, None))
    ref_plain = fovea_reference(x, None)
    assert jnp.allclose(out_plain, ref_plain, atol=5e-3, rtol=5e-3), (
        float(jnp.max(jnp.abs(out_plain - ref_plain))))

    print("KERNEL_OK")
</pallas_src>

<mosaic_0001>
module attributes {stable_mosaic.version = 11 : i64} {
  func.func @_fovea_kernel(%arg0: i32, %arg1: memref<1xf32, #tpu.memory_space<smem>>, %arg2: memref<8x256xf32, #tpu.memory_space<vmem>>, %arg3: memref<8x256xf32, #tpu.memory_space<vmem>>) attributes {dimension_semantics = [#tpu.dimension_semantics<parallel>], iteration_bounds = array<i64: 1>, scalar_prefetch = 0 : i64, scratch_operands = 0 : i64, tpu.core_type = #tpu.core_type<tc>, window_params = [{transform_indices = @transform_0, window_bounds = array<i64: 1>}, {transform_indices = @transform_1, window_bounds = array<i64: 8, 256>}, {transform_indices = @transform_2, window_bounds = array<i64: 8, 256>}]} {
    %c0 = arith.constant 0 : index
    %c0_0 = arith.constant 0 : index
    %0 = vector.load %arg2[%c0, %c0_0] : memref<8x256xf32, #tpu.memory_space<vmem>>, vector<8x256xf32>
    %c0_1 = arith.constant 0 : index
    %1 = memref.load %arg1[%c0_1] : memref<1xf32, #tpu.memory_space<smem>>
    %2 = vector.broadcast %1 : f32 to vector<8x256xf32>
    %3 = arith.mulf %0, %2 : vector<8x256xf32>
    %cst = arith.constant dense<0xFF800000> : vector<8xf32>
    %4 = vector.multi_reduction <maximumf>, %3, %cst [1] : vector<8x256xf32> to vector<8xf32>
    %5 = vector.shape_cast %4 : vector<8xf32> to vector<8x1xf32>
    %6 = vector.broadcast %5 : vector<8x1xf32> to vector<8x256xf32>
    %7 = arith.subf %3, %6 : vector<8x256xf32>
    %8 = math.exp %7 : vector<8x256xf32>
    %cst_2 = arith.constant dense<0.000000e+00> : vector<8xf32>
    %9 = vector.multi_reduction <add>, %8, %cst_2 [1] : vector<8x256xf32> to vector<8xf32>
    %10 = vector.shape_cast %9 : vector<8xf32> to vector<8x1xf32>
    %11 = tpu.reciprocal %10 {approx = true} : vector<8x1xf32> -> vector<8x1xf32>
    %12 = vector.broadcast %11 : vector<8x1xf32> to vector<8x256xf32>
    %13 = arith.mulf %8, %12 : vector<8x256xf32>
    %14 = arith.mulf %13, %0 : vector<8x256xf32>
    %c0_3 = arith.constant 0 : index
    %c0_4 = arith.constant 0 : index
    %15 = vector.load %arg3[%c0_3, %c0_4] : memref<8x256xf32, #tpu.memory_space<vmem>>, vector<8x256xf32>
    tpu.vector_store %arg3[%c0_3, %c0_4], %14 {strides = array<i32>} : memref<8x256xf32, #tpu.memory_space<vmem>>, vector<8x256xf32>,
    return
  }
  func.func @transform_0(%arg0: i32) -> i32 {
    %c0_i32 = arith.constant 0 : i32
    %c0_i32_0 = arith.constant 0 : i32
    return %c0_i32 : i32
  }
  func.func @transform_1(%arg0: i32) -> (i32, i32) {
    %c0_i32 = arith.constant 0 : i32
    %c0_i32_0 = arith.constant 0 : i32
    return %arg0, %c0_i32 : i32, i32
  }
  func.func @transform_2(%arg0: i32) -> (i32, i32) {
    %c0_i32 = arith.constant 0 : i32
    %c0_i32_0 = arith.constant 0 : i32
    return %arg0, %c0_i32 : i32, i32
  }
}

</mosaic_0001>

<bundles_post_ra>
// kernel: _fovea_2d.1
= control target key start
LH: loop header
LB: loop body
LE: loop exit
PB: predicated region body
PF: predicated region fallthrough
CT: control target
= control target key end

     0   :  { %8 = vsyncpa [#allocation4], 0  ;;  %s165_s0 = inlined_call_operand.<no memory space> [shape: f32[1], index: 0, kind: input, shape index: {}]   ;;  %s166_s1 = inlined_call_operand.hbm [shape: f32[8,256], index: 1, kind: input, shape index: {}]   ;;  %s167_s2 = inlined_call_operand.hbm [shape: f32[8,256], index: 2, kind: output, shape index: {}]  }
   0x1   :  { %9 = vsyncpa [#allocation5], 0  ;;  %s121_s9 = smov [#allocation3]   ;;  %s73_s13 = scalar_lea.hbm %s166_s1, 256 }
   0x2   :  { %s18_s10 = sshll.u32 %s121_s9, 4  ;;  %p74_p0 = scmp.ne.s32.totalorder %s166_s1, %s73_s13  ;;  %s19_s10 = int_to_ptr.vmem [resolvable:$true] %s18_s10 }
   0x3   :  { %p77_p1 = scmp.lt.u32.totalorder %s73_s13, %s166_s1 }
   0x5   :  { %p79_p2 = pnand %p77_p1, %p74_p0 }
   0x7   :  { %82 = shalt.err (!%p79_p2)
}
   0x8   :  { %s83_s18 = scalar_lea.vmem %s19_s10, 256  ;;  %p88_p4 = scmp.lt.s32.totalorder %s19_s10, %s19_s10 }
   0x9   :  { %p84_p3 = scmp.ne.s32.totalorder %s19_s10, %s83_s18  ;;  %p89_p5 = scmp.lt.s32.totalorder %s83_s18, %s83_s18 }
   0xb   :  { %p90_p6 = por %p89_p5, %p88_p4 }
   0xd   :  { %p91_p7 = pnand %p90_p6, %p84_p3 }
   0xf   :  { %94 = shalt.err (!%p91_p7)
}
  0x10   :  { %21 = dma.hbm_to_vmem [thread:$0]  %s166_s1, 256, %s19_s10, [#allocation4]  }
  0x11   :  { %117 = dma.done.wait [#allocation4], 256  }
  0x12   :  { %118 = vsyncadd [#allocation4], 4294967040  ;;  %v28_v0 = vstv %s165_s0  ;;  %v25_v1 = vld [vmem:[#allocation3] sm:$0xff]  ;;  %v26_v2 = vld [vmem:[#allocation3 + $0x8] sm:$0xff]  ;;  %s122_s0 = smov [#allocation6]  }
  0x13   :  { %v29_v3 = vmul.f32 %v28_v0, %v25_v1  ;;  %v30_v4 = vmul.f32 %v28_v0, %v26_v2  ;;  %s56_s1 = sshll.u32 %s122_s0, 4  ;;  %s57_s1 = int_to_ptr.vmem [resolvable:$true] %s56_s1 }
  0x14   :  { %s95_s23 = scalar_lea.vmem %s57_s1, 256  ;;  %p100_p9 = scmp.lt.s32.totalorder %s57_s1, %s57_s1 }
  0x15   :  { %v31_v5 = vmax.f32 %v29_v3, %v30_v4  ;;  %p96_p8 = scmp.ne.s32.totalorder %s57_s1, %s95_s23  ;;  %p101_p10 = scmp.lt.s32.totalorder %s95_s23, %s95_s23 }
  0x17   :  { %32 = vmax.xlane.f32.xlu0 %v31_v5  ;;  %p102_p11 = por %p101_p10, %p100_p9 }
  0x19   :  { %p103_p12 = pnand %p102_p11, %p96_p8 }
  0xa4   :  { %v33_v6 = vpop.xlane.xlu0 %32 }
  0xa5   :  { %v34_v7 = vsub.f32 %v29_v3, %v33_v6  ;;  %v35_v8 = vsub.f32 %v30_v4, %v33_v6 }
  0xa7   :  { %v36_v9 = vmul.f32 1.442695, %v34_v7  ;;  %v38_v10 = vmul.f32 1.442695, %v35_v8 }
  0xa9   :  { %67 = vpow2.f32 %v36_v9 }
  0xaa   :  { %69 = vpow2.f32 %v38_v10 }
  0xb3   :  { %v68_v11 = vpop.eup %67 }
  0xb4   :  { %v70_v12 = vpop.eup %69 }
  0xb5   :  { %v40_v13 = vadd.f32 %v70_v12, %v68_v11 }
  0xb7   :  { %41 = vadd.xlane.f32.xlu0 %v40_v13 }
 0x144   :  { %v42_v14 = vpop.xlane.xlu0 %41 }
 0x145   :  { %71 = vrcp.f32 %v42_v14 }
 0x14f   :  { %v72_v15 = vpop.eup %71 }
 0x150   :  { %v44_v16 = vmul.f32 %v72_v15, %v68_v11  ;;  %v45_v17 = vmul.f32 %v72_v15, %v70_v12 }
 0x152   :  { %v46_v18 = vmul.f32 %v44_v16, %v25_v1  ;;  %v47_v19 = vmul.f32 %v45_v17, %v26_v2 }
 0x154   :  { %48 = vst [vmem:[#allocation6] sm:$0xff] %v46_v18  ;;  %49 = vst [vmem:[#allocation6 + $0x8] sm:$0xff] %v47_v19 }
 0x155   :  { %106 = shalt.err (!%p103_p12)
}
 0x156   :  { %s107_s26 = scalar_lea.hbm %s167_s2, 256 }
 0x157   :  { %p108_p13 = scmp.ne.s32.totalorder %s167_s2, %s107_s26  ;;  %p111_p0 = scmp.lt.u32.totalorder %s107_s26, %s167_s2 }
 0x159   :  { %p113_p1 = pnand %p111_p0, %p108_p13 }
 0x15b   :  { %116 = shalt.err (!%p113_p1)
}
 0x15c   :  { %59 = dma.vmem_to_hbm [thread:$0]  %s57_s1, 256, %s167_s2, [#allocation5]  }
 0x15d   :  { %119 = dma.done.wait [#allocation5], 256  }
 0x15e   :  { %120 = vsyncadd [#allocation5], 4294967040 }
 0x15f   :  { %63 = vsyncpa [#allocation4], 1 }
 0x160   :  { %64 = vsyncpa [#allocation5], 1 }

</bundles_post_ra>
